<compile_context>
chip_gen: v6e
topology: v6e:2x2x1
jax: 0.10.0
libtpu: 0.0.40
codegen_flags: <defaults>
</compile_context>

<pallas_src>
import jax
import jax.numpy as jnp
from jax import lax
from jax.experimental import pallas as pl
from jax.experimental.pallas import tpu as pltpu


def multistep_step_kernel(x_ref, w1_ref, b1_ref, w2_ref, b2_ref,
                          res_ref, state_ref):
    """One rollout step; grid = (batch_tile, step).

    x_ref:     (TB, W)    VMEM  initial state tile (block index constant over
                                the step axis -> DMA'd once per batch tile)
    w1_ref:    (3, H, 1)  VMEM  conv1 taps, H on sublanes
    b1_ref:    (H, 1)     VMEM  conv1 bias
    w2_ref:    (3, H, 1)  VMEM  conv2 taps
    b2_ref:    (1,)       SMEM  conv2 bias (scalar)
    res_ref:   (1, TB, W) VMEM  output slab for this step (lane-dense store)
    state_ref: (TB, W)    VMEM  recurrent state carried across the step axis
    """
    step = pl.program_id(1)
    TB, W = state_ref.shape

    @pl.when(step == 0)
    def _():
        state_ref[...] = x_ref[...]

    lane = lax.broadcasted_iota(jnp.int32, (TB, W), dimension=1)
    left_edge = lane == 0
    right_edge = lane == (W - 1)

    def shift_right(v):   # result[w] = v[w-1], 0 at w=0   (zero-padded conv tap)
        return jnp.where(left_edge, 0.0, pltpu.roll(v, shift=1, axis=1))

    def shift_left(v):    # result[w] = v[w+1], 0 at w=W-1
        return jnp.where(right_edge, 0.0, pltpu.roll(v, shift=W - 1, axis=1))

    # Weights: a handful of tiny VMEM vector loads per step (no SMEM scalar
    # loops).  H lives on sublanes so all VPU ops below run on full vreg tiles.
    w1 = w1_ref[...]      # (3, H, 1)
    b1 = b1_ref[...]      # (H, 1)
    w2 = w2_ref[...]      # (3, H, 1)
    b2 = b2_ref[0]        # scalar

    x = state_ref[...]                    # (TB, W) f32
    xm1 = shift_right(x)                  # XLU roll + one-lane boundary mask
    xp1 = shift_left(x)

    # conv1 -> ReLU for all H channels at once on a (TB, H, W) tile.
    pre = (w1[0][None] * xm1[:, None, :]
           + w1[1][None] * x[:, None, :]
           + w1[2][None] * xp1[:, None, :]
           + b1[None])
    h = jnp.maximum(pre, 0.0)

    # conv2 channel reduction: three sublane (XLU) reduces over H.
    s0 = jnp.sum(w2[0][None] * h, axis=1)     # (TB, W)
    s1 = jnp.sum(w2[1][None] * h, axis=1)
    s2 = jnp.sum(w2[2][None] * h, axis=1)

    # y[w] = b2 + s0[w-1] + s1[w] + s2[w+1]
    y = (s1 + b2) + shift_right(s0) + shift_left(s2)

    res_ref[0] = y            # dense (TB, W) store of this step's prediction
    state_ref[...] = y        # feed prediction back in (x = model(x))


def _pick_batch_tile(batch):
    for cand in (64, 32, 16, 8):
        if batch % cand == 0:
            return cand
    return batch              # small / odd batches: single tile


def multistep_forward(x, w1, b1, w2, b2, niter):
    """x: (B, 1, W) (NCW, single channel). Returns (B, niter, W) like the torch module."""
    B, C, W = x.shape
    assert C == 1, "one-step model expects a single input channel"
    H = w1.shape[0]
    TB = _pick_batch_tile(B)

    x2 = x[:, 0, :].astype(jnp.float32)                       # (B, W)
    w1v = jnp.transpose(w1.astype(jnp.float32))[:, :, None]   # (3, H, 1)
    b1v = b1.astype(jnp.float32)[:, None]                     # (H, 1)
    w2v = jnp.transpose(w2.astype(jnp.float32))[:, :, None]   # (3, H, 1)
    b2v = jnp.reshape(b2, (1,)).astype(jnp.float32)           # (1,)

    grid = (B // TB, niter)

    res_t = pl.pallas_call(
        multistep_step_kernel,
        out_shape=jax.ShapeDtypeStruct((niter, B, W), jnp.float32),
        grid_spec=pltpu.PrefetchScalarGridSpec(
            num_scalar_prefetch=0,
            grid=grid,
            in_specs=[
                pl.BlockSpec((TB, W), lambda b, i: (b, 0)),           # x2
                pl.BlockSpec((3, H, 1), lambda b, i: (0, 0, 0)),      # w1v
                pl.BlockSpec((H, 1), lambda b, i: (0, 0)),            # b1v
                pl.BlockSpec((3, H, 1), lambda b, i: (0, 0, 0)),      # w2v
                pl.BlockSpec(memory_space=pltpu.MemorySpace.SMEM),    # b2v
            ],
            out_specs=pl.BlockSpec((1, TB, W), lambda b, i: (i, b, 0)),
            scratch_shapes=[pltpu.VMEM((TB, W), jnp.float32)],
        ),
        compiler_params=pltpu.CompilerParams(
            dimension_semantics=("parallel", "arbitrary")),
    )(x2, w1v, b1v, w2v, b2v)

    # Layout plumbing only: kernel emits (niter, B, W) so every in-kernel store
    # is a dense (TB, W) slab; present the module's (B, niter, W) layout here.
    return jnp.transpose(res_t, (1, 0, 2)).astype(x.dtype)


def one_step_ref(x2, w1, b1, w2, b2):
    """Pure-JAX reference of the one-step Conv1d->ReLU->Conv1d model on (B, W)."""
    xm1 = jnp.pad(x2, ((0, 0), (1, 0)))[:, :-1]
    xp1 = jnp.pad(x2, ((0, 0), (0, 1)))[:, 1:]
    h = jax.nn.relu(w1[None, :, 0, None] * xm1[:, None, :]
                    + w1[None, :, 1, None] * x2[:, None, :]
                    + w1[None, :, 2, None] * xp1[:, None, :]
                    + b1[None, :, None])                      # (B, H, W)
    hm1 = jnp.pad(h, ((0, 0), (0, 0), (1, 0)))[:, :, :-1]
    hp1 = jnp.pad(h, ((0, 0), (0, 0), (0, 1)))[:, :, 1:]
    y = b2 + jnp.sum(w2[None, :, 0, None] * hm1
                     + w2[None, :, 1, None] * h
                     + w2[None, :, 2, None] * hp1, axis=1)    # (B, W)
    return y


if __name__ == "__main__":
    B, W, H, NITER = 2, 128, 8, 4

    key = jax.random.PRNGKey(0)
    kx, k1, k2, k3, k4 = jax.random.split(key, 5)

    x = jax.random.normal(kx, (B, 1, W), dtype=jnp.float32)
    w1 = 0.1 * jax.random.normal(k1, (H, 3), dtype=jnp.float32)   # Conv1d(1->H, k=3)
    b1 = 0.05 * jax.random.normal(k2, (H,), dtype=jnp.float32)
    w2 = 0.1 * jax.random.normal(k3, (H, 3), dtype=jnp.float32)   # Conv1d(H->1, k=3)
    b2 = 0.05 * jax.random.normal(k4, (), dtype=jnp.float32)

    out = jax.block_until_ready(multistep_forward(x, w1, b1, w2, b2, NITER))
    assert out.shape == (B, NITER, W), out.shape

    # Pure-JAX reference of the multistep rollout for verification.
    ref_rows = []
    cur = x[:, 0, :]
    for _ in range(NITER):
        cur = one_step_ref(cur, w1, b1, w2, b2)
        ref_rows.append(cur)
    ref = jnp.stack(ref_rows, axis=1)  # (B, Niter, W)

    if not jnp.allclose(out, ref, rtol=1e-4, atol=1e-5):
        raise AssertionError(f"mismatch: max abs err {jnp.max(jnp.abs(out - ref))}")

    print("KERNEL_OK")
</pallas_src>

<mosaic_0001>
module attributes {stable_mosaic.version = 11 : i64} {
  func.func @multistep_step_kernel(%arg0: i32, %arg1: i32, %arg2: memref<2x128xf32, #tpu.memory_space<vmem>>, %arg3: memref<3x8x1xf32, #tpu.memory_space<vmem>>, %arg4: memref<8x1xf32, #tpu.memory_space<vmem>>, %arg5: memref<3x8x1xf32, #tpu.memory_space<vmem>>, %arg6: memref<1xf32, #tpu.memory_space<smem>>, %arg7: memref<1x2x128xf32, #tpu.memory_space<vmem>>, %arg8: memref<2x128xf32, #tpu.memory_space<vmem>>) attributes {dimension_semantics = [#tpu.dimension_semantics<parallel>, #tpu.dimension_semantics<arbitrary>], iteration_bounds = array<i64: 1, 4>, scalar_prefetch = 0 : i64, scratch_operands = 1 : i64, tpu.core_type = #tpu.core_type<tc>, window_params = [{transform_indices = @transform_0, window_bounds = array<i64: 2, 128>}, {pipeline_mode = #tpu.pipeline_mode<synchronous>, transform_indices = @transform_1, window_bounds = array<i64: 3, 8, 1>}, {pipeline_mode = #tpu.pipeline_mode<synchronous>, transform_indices = @transform_2, window_bounds = array<i64: 8, 1>}, {pipeline_mode = #tpu.pipeline_mode<synchronous>, transform_indices = @transform_3, window_bounds = array<i64: 3, 8, 1>}, {transform_indices = @transform_4, window_bounds = array<i64: 1>}, {transform_indices = @transform_5, window_bounds = array<i64: 1, 2, 128>}]} {
    %c0_i32 = arith.constant 0 : i32
    %0 = arith.cmpi eq, %arg1, %c0_i32 : i32
    %1 = arith.extui %0 : i1 to i32
    %c0_i32_0 = arith.constant 0 : i32
    %2 = arith.cmpi ne, %1, %c0_i32_0 : i32
    scf.if %2 {
      %c0_27 = arith.constant 0 : index
      %c0_28 = arith.constant 0 : index
      %79 = vector.load %arg2[%c0_27, %c0_28] : memref<2x128xf32, #tpu.memory_space<vmem>>, vector<2x128xf32>
      %c0_29 = arith.constant 0 : index
      %c0_30 = arith.constant 0 : index
      %80 = vector.load %arg8[%c0_29, %c0_30] : memref<2x128xf32, #tpu.memory_space<vmem>>, vector<2x128xf32>
      tpu.vector_store %arg8[%c0_29, %c0_30], %79 {strides = array<i32>} : memref<2x128xf32, #tpu.memory_space<vmem>>, vector<2x128xf32>,
    } else {
    }
    %3 = tpu.iota {dimensions = array<i32: 1>} : vector<2x128xi32>
    %c0_i32_1 = arith.constant 0 : i32
    %4 = vector.broadcast %c0_i32_1 : i32 to vector<2x128xi32>
    %5 = arith.cmpi eq, %3, %4 : vector<2x128xi32>
    %c127_i32 = arith.constant 127 : i32
    %6 = vector.broadcast %c127_i32 : i32 to vector<2x128xi32>
    %7 = arith.cmpi eq, %3, %6 : vector<2x128xi32>
    %c0 = arith.constant 0 : index
    %c0_2 = arith.constant 0 : index
    %c0_3 = arith.constant 0 : index
    %8 = vector.load %arg3[%c0, %c0_2, %c0_3] : memref<3x8x1xf32, #tpu.memory_space<vmem>>, vector<3x8x1xf32>
    %c0_4 = arith.constant 0 : index
    %c0_5 = arith.constant 0 : index
    %9 = vector.load %arg4[%c0_4, %c0_5] : memref<8x1xf32, #tpu.memory_space<vmem>>, vector<8x1xf32>
    %c0_6 = arith.constant 0 : index
    %c0_7 = arith.constant 0 : index
    %c0_8 = arith.constant 0 : index
    %10 = vector.load %arg5[%c0_6, %c0_7, %c0_8] : memref<3x8x1xf32, #tpu.memory_space<vmem>>, vector<3x8x1xf32>
    %c0_9 = arith.constant 0 : index
    %11 = memref.load %arg6[%c0_9] : memref<1xf32, #tpu.memory_space<smem>>
    %c0_10 = arith.constant 0 : index
    %c0_11 = arith.constant 0 : index
    %12 = vector.load %arg8[%c0_10, %c0_11] : memref<2x128xf32, #tpu.memory_space<vmem>>, vector<2x128xf32>
    %c1_i32 = arith.constant 1 : i32
    %13 = tpu.dynamic_rotate %12 by %c1_i32 dim 1 : vector<2x128xf32>, i32 -> vector<2x128xf32>
    %cst = arith.constant 0.000000e+00 : f32
    %14 = vector.broadcast %cst : f32 to vector<2x128xf32>
    %15 = arith.select %5, %14, %13 : vector<2x128xi1>, vector<2x128xf32>
    %c127_i32_12 = arith.constant 127 : i32
    %16 = tpu.dynamic_rotate %12 by %c127_i32_12 dim 1 : vector<2x128xf32>, i32 -> vector<2x128xf32>
    %cst_13 = arith.constant 0.000000e+00 : f32
    %17 = vector.broadcast %cst_13 : f32 to vector<2x128xf32>
    %18 = arith.select %7, %17, %16 : vector<2x128xi1>, vector<2x128xf32>
    %19 = vector.extract_strided_slice %8 {offsets = [0, 0, 0], sizes = [1, 8, 1], strides = [1, 1, 1]} : vector<3x8x1xf32> to vector<1x8x1xf32>
    %20 = vector.shape_cast %19 : vector<1x8x1xf32> to vector<8x1xf32>
    %21 = vector.shape_cast %20 : vector<8x1xf32> to vector<1x8x1xf32>
    %22 = vector.shape_cast %15 : vector<2x128xf32> to vector<2x1x128xf32>
    %23 = vector.broadcast %21 : vector<1x8x1xf32> to vector<2x8x128xf32>
    %24 = vector.broadcast %22 : vector<2x1x128xf32> to vector<2x8x128xf32>
    %25 = arith.mulf %23, %24 : vector<2x8x128xf32>
    %26 = vector.extract_strided_slice %8 {offsets = [1, 0, 0], sizes = [1, 8, 1], strides = [1, 1, 1]} : vector<3x8x1xf32> to vector<1x8x1xf32>
    %27 = vector.shape_cast %26 : vector<1x8x1xf32> to vector<8x1xf32>
    %28 = vector.shape_cast %27 : vector<8x1xf32> to vector<1x8x1xf32>
    %29 = vector.shape_cast %12 : vector<2x128xf32> to vector<2x1x128xf32>
    %30 = vector.broadcast %28 : vector<1x8x1xf32> to vector<2x8x128xf32>
    %31 = vector.broadcast %29 : vector<2x1x128xf32> to vector<2x8x128xf32>
    %32 = arith.mulf %30, %31 : vector<2x8x128xf32>
    %33 = arith.addf %25, %32 : vector<2x8x128xf32>
    %34 = vector.extract_strided_slice %8 {offsets = [2, 0, 0], sizes = [1, 8, 1], strides = [1, 1, 1]} : vector<3x8x1xf32> to vector<1x8x1xf32>
    %35 = vector.shape_cast %34 : vector<1x8x1xf32> to vector<8x1xf32>
    %36 = vector.shape_cast %35 : vector<8x1xf32> to vector<1x8x1xf32>
    %37 = vector.shape_cast %18 : vector<2x128xf32> to vector<2x1x128xf32>
    %38 = vector.broadcast %36 : vector<1x8x1xf32> to vector<2x8x128xf32>
    %39 = vector.broadcast %37 : vector<2x1x128xf32> to vector<2x8x128xf32>
    %40 = arith.mulf %38, %39 : vector<2x8x128xf32>
    %41 = arith.addf %33, %40 : vector<2x8x128xf32>
    %42 = vector.shape_cast %9 : vector<8x1xf32> to vector<1x8x1xf32>
    %43 = vector.broadcast %42 : vector<1x8x1xf32> to vector<2x8x128xf32>
    %44 = arith.addf %41, %43 : vector<2x8x128xf32>
    %cst_14 = arith.constant 0.000000e+00 : f32
    %45 = vector.broadcast %cst_14 : f32 to vector<2x8x128xf32>
    %46 = arith.maximumf %44, %45 : vector<2x8x128xf32>
    %47 = vector.extract_strided_slice %10 {offsets = [0, 0, 0], sizes = [1, 8, 1], strides = [1, 1, 1]} : vector<3x8x1xf32> to vector<1x8x1xf32>
    %48 = vector.shape_cast %47 : vector<1x8x1xf32> to vector<8x1xf32>
    %49 = vector.shape_cast %48 : vector<8x1xf32> to vector<1x8x1xf32>
    %50 = vector.broadcast %49 : vector<1x8x1xf32> to vector<2x8x128xf32>
    %51 = arith.mulf %50, %46 : vector<2x8x128xf32>
    %cst_15 = arith.constant dense<0.000000e+00> : vector<2x128xf32>
    %52 = vector.multi_reduction <add>, %51, %cst_15 [1] : vector<2x8x128xf32> to vector<2x128xf32>
    %53 = vector.extract_strided_slice %10 {offsets = [1, 0, 0], sizes = [1, 8, 1], strides = [1, 1, 1]} : vector<3x8x1xf32> to vector<1x8x1xf32>
    %54 = vector.shape_cast %53 : vector<1x8x1xf32> to vector<8x1xf32>
    %55 = vector.shape_cast %54 : vector<8x1xf32> to vector<1x8x1xf32>
    %56 = vector.broadcast %55 : vector<1x8x1xf32> to vector<2x8x128xf32>
    %57 = arith.mulf %56, %46 : vector<2x8x128xf32>
    %cst_16 = arith.constant dense<0.000000e+00> : vector<2x128xf32>
    %58 = vector.multi_reduction <add>, %57, %cst_16 [1] : vector<2x8x128xf32> to vector<2x128xf32>
    %59 = vector.extract_strided_slice %10 {offsets = [2, 0, 0], sizes = [1, 8, 1], strides = [1, 1, 1]} : vector<3x8x1xf32> to vector<1x8x1xf32>
    %60 = vector.shape_cast %59 : vector<1x8x1xf32> to vector<8x1xf32>
    %61 = vector.shape_cast %60 : vector<8x1xf32> to vector<1x8x1xf32>
    %62 = vector.broadcast %61 : vector<1x8x1xf32> to vector<2x8x128xf32>
    %63 = arith.mulf %62, %46 : vector<2x8x128xf32>
    %cst_17 = arith.constant dense<0.000000e+00> : vector<2x128xf32>
    %64 = vector.multi_reduction <add>, %63, %cst_17 [1] : vector<2x8x128xf32> to vector<2x128xf32>
    %65 = vector.broadcast %11 : f32 to vector<2x128xf32>
    %66 = arith.addf %58, %65 : vector<2x128xf32>
    %c1_i32_18 = arith.constant 1 : i32
    %67 = tpu.dynamic_rotate %52 by %c1_i32_18 dim 1 : vector<2x128xf32>, i32 -> vector<2x128xf32>
    %cst_19 = arith.constant 0.000000e+00 : f32
    %68 = vector.broadcast %cst_19 : f32 to vector<2x128xf32>
    %69 = arith.select %5, %68, %67 : vector<2x128xi1>, vector<2x128xf32>
    %70 = arith.addf %66, %69 : vector<2x128xf32>
    %c127_i32_20 = arith.constant 127 : i32
    %71 = tpu.dynamic_rotate %64 by %c127_i32_20 dim 1 : vector<2x128xf32>, i32 -> vector<2x128xf32>
    %cst_21 = arith.constant 0.000000e+00 : f32
    %72 = vector.broadcast %cst_21 : f32 to vector<2x128xf32>
    %73 = arith.select %7, %72, %71 : vector<2x128xi1>, vector<2x128xf32>
    %74 = arith.addf %70, %73 : vector<2x128xf32>
    %c0_22 = arith.constant 0 : index
    %c0_23 = arith.constant 0 : index
    %c0_24 = arith.constant 0 : index
    %75 = vector.load %arg7[%c0_22, %c0_23, %c0_24] : memref<1x2x128xf32, #tpu.memory_space<vmem>>, vector<1x2x128xf32>
    %76 = vector.shape_cast %75 : vector<1x2x128xf32> to vector<2x128xf32>
    %77 = vector.shape_cast %74 : vector<2x128xf32> to vector<1x2x128xf32>
    tpu.vector_store %arg7[%c0_22, %c0_23, %c0_24], %77 {strides = array<i32>} : memref<1x2x128xf32, #tpu.memory_space<vmem>>, vector<1x2x128xf32>,
    %c0_25 = arith.constant 0 : index
    %c0_26 = arith.constant 0 : index
    %78 = vector.load %arg8[%c0_25, %c0_26] : memref<2x128xf32, #tpu.memory_space<vmem>>, vector<2x128xf32>
    tpu.vector_store %arg8[%c0_25, %c0_26], %74 {strides = array<i32>} : memref<2x128xf32, #tpu.memory_space<vmem>>, vector<2x128xf32>,
    return
  }
  func.func @transform_0(%arg0: i32, %arg1: i32) -> (i32, i32) {
    %c0_i32 = arith.constant 0 : i32
    %c0_i32_0 = arith.constant 0 : i32
    return %arg0, %c0_i32 : i32, i32
  }
  func.func @transform_1(%arg0: i32, %arg1: i32) -> (i32, i32, i32) {
    %c0_i32 = arith.constant 0 : i32
    %c0_i32_0 = arith.constant 0 : i32
    %c0_i32_1 = arith.constant 0 : i32
    %c0_i32_2 = arith.constant 0 : i32
    return %c0_i32, %c0_i32_0, %c0_i32_1 : i32, i32, i32
  }
  func.func @transform_2(%arg0: i32, %arg1: i32) -> (i32, i32) {
    %c0_i32 = arith.constant 0 : i32
    %c0_i32_0 = arith.constant 0 : i32
    %c0_i32_1 = arith.constant 0 : i32
    return %c0_i32, %c0_i32_0 : i32, i32
  }
  func.func @transform_3(%arg0: i32, %arg1: i32) -> (i32, i32, i32) {
    %c0_i32 = arith.constant 0 : i32
    %c0_i32_0 = arith.constant 0 : i32
    %c0_i32_1 = arith.constant 0 : i32
    %c0_i32_2 = arith.constant 0 : i32
    return %c0_i32, %c0_i32_0, %c0_i32_1 : i32, i32, i32
  }
  func.func @transform_4(%arg0: i32, %arg1: i32) -> i32 {
    %c0_i32 = arith.constant 0 : i32
    %c0_i32_0 = arith.constant 0 : i32
    return %c0_i32 : i32
  }
  func.func @transform_5(%arg0: i32, %arg1: i32) -> (i32, i32, i32) {
    %c0_i32 = arith.constant 0 : i32
    %c0_i32_0 = arith.constant 0 : i32
    return %arg1, %arg0, %c0_i32 : i32, i32, i32
  }
}

</mosaic_0001>

<bundles_post_ra>
// kernel: tpu_custom_call.1
= control target key start
LH: loop header
LB: loop body
LE: loop exit
PB: predicated region body
PF: predicated region fallthrough
CT: control target
= control target key end

     0   :  { %s922_s0 = inlined_call_operand.vmem [shape: f32[2,128], index: 0, kind: input, shape index: {}]   ;;  %s923_s1 = inlined_call_operand.vmem [shape: f32[3,8,1], index: 1, kind: input, shape index: {}]   ;;  %s924_s2 = inlined_call_operand.vmem [shape: f32[8,1], index: 2, kind: input, shape index: {}]   ;;  %s925_s3 = inlined_call_operand.vmem [shape: f32[3,8,1], index: 3, kind: input, shape index: {}]   ;;  %s926_s4 = inlined_call_operand.<no memory space> [shape: f32[1], index: 4, kind: input, shape index: {}]   ;;  %s927_s5 = inlined_call_operand.hbm [shape: f32[4,2,128], index: 5, kind: output, shape index: {}]  }
   0x1   :  { %10 = sst [smem:[#allocation3]] %s926_s4 }
   0x2   :  { %11 = vsyncpa [#allocation5], 0 }
   0x3   :  { %13 = vsyncpa [#allocation5 + $0x1], 0  ;;  %s761_s20 = smov 0   ;;  %s763_s21 = smov 0  }
   0x4   :  { %s765_s22 = smov 0   ;;  %s767_s23 = smov 0  }
   0x5   :  { %s769_s24 = smov 0   ;;  %s771_s25 = smov 0  }
   0x6 LB: > { %s573_s4 = sadd.s32 4294967295, %s721_s25   ;;  %s574_s26 = sadd.s32 4294967294, %s721_s25   ;;  %s721_s25 = sphi %s771_s25, %s19_s25   ;;  %s717_s24 = sphi %s769_s24, %s934_s24   ;;  %s713_s23 = sphi %s767_s23, %s933_s23   ;;  %s709_s22 = sphi %s765_s22, %s932_s22   ;;  %s705_s21 = sphi %s763_s21, %s931_s21   ;;  %s701_s20 = sphi %s761_s20, %s930_s20  }
   0x7   : > { %s28_s27 = sadd.s32 1, %s717_s24  ;;  %s150_s28 = sadd.s32 1, %s709_s22 }
   0x8   : > { %p29_p0 = scmp.ge.s32.totalorder %s28_s27, 4  ;;  %p160_p1 = scmp.ne.s32.totalorder %s709_s22, %s705_s21 }
   0x9   : > { %p161_p2 = scmp.eq.s32.totalorder %s573_s4, 3  ;;  %p166_p3 = scmp.ne.s32.totalorder %s705_s21, %s701_s20 }
   0xa   : > { %s936_s27 = smov (%p29_p0, %s28_s27), 0  ;;  %p167_p5 = scmp.eq.s32.totalorder %s574_s26, 3 }
   0xb   : > { %p801_p4 = por %p161_p2, %p160_p1  ;;  %s145_s30 = ssub.s32 %s717_s24, %s936_s27 }
   0xc   : > { %p577_p6 = scmp.ge.s32.totalorder %s721_s25, 1  ;;  %p148_p7 = scmp.eq.s32.totalorder %s145_s30, 0 }
   0xd   : > { %p808_p8 = por %p167_p5, %p166_p3  ;;  %p204_p9 = scmp.lt.s32.totalorder %s721_s25, 5 }
   0xe   : > { %s814_s7 = scalar_select %p148_p7, %s709_s22, %s150_s28  }
   0xf   : > { %p205_p10 = pnand %p577_p6, %p204_p9 }
  0x10   : > { %s228_s8 = sand.u32 (!%p205_p10), 1, %s705_s21   ;;  %p579_p11 = scmp.ne.s32.totalorder (!%p205_p10), %s713_s23, 0 }
  0x11   : > { %208 = sbr.rel (%p205_p10) target bundleno = 329 (0x149), region = 40  ;;  %s819_s9 = sshll.u32 (!%p205_p10), %s228_s8, 1 }
  0x12   : > { %s230_s10 = scalar_lea.vmem (!%p205_p10), [#allocation4], %s819_s9 }
  0x16   : > { %238 = sbr.rel (%p579_p11) target bundleno = 29 (0x1d), region = 44 }
  0x1b   : > { %v239_v0 = vld [vmem:[%s922_s0] sm:$0x3] }
  0x1c   : > { %240 = vst [vmem:[#allocation2] sm:$0x3] %v239_v0 }
  0x1d PF: > { %v723_v2 = vmov 0   ;;  %s724_s13 = smov 1   ;;  %v245_v3 = vld [vmem:[%s923_s1] sm:$0xff]  ;;  %v246_v4 = vld [vmem:[%s923_s1 + $0x8] sm:$0xff]  ;;  %s725_s18 = smov 127   ;;  %v247_v5 = vld [vmem:[%s923_s1 + $0x10] sm:$0xff]  ;;  %v241_v12 = vlaneseq }
  0x1e   : > { %643 = vset.pattern.permute.xlu1 %v723_v2  ;;  %644 = vset.pattern.permute.xlu0 %v723_v2  ;;  %v248_v6 = vld [vmem:[%s924_s2] sm:$0xff]  ;;  %v251_v7 = vld [vmem:[%s925_s3 + $0x10] sm:$0xff]  ;;  %v250_v9 = vld [vmem:[%s925_s3 + $0x8] sm:$0xff]  ;;  %v726_v10 = vmov 1966171168   ;;  %vm455_vm2 = vcmask 1041409  }
  0x1f   : > { %285 = vperm.xlu1 %643, %v245_v3   ;;  %v249_v8 = vld [vmem:[%s925_s3] sm:$0xff]  ;;  %v262_v11 = vunpack.c.l.s4 %v726_v10  ;;  %v265_v14 = vshrl.u32 %v241_v12, 7  ;;  %v849_v15 = vand.u32 127, %v241_v12  ;;  %s252_s17 = sld [smem:[#allocation3]]  ;;  %s727_s30 = smov [#allocation4]  }
  0x20   : > { %s649_s11 = sshll.u32 %s727_s30, 4  ;;  %s650_s11 = int_to_ptr.vmem [resolvable:$false] %s649_s11 }
  0x21   : > { %v263_v13 = vunpack.c.0.s8 %v262_v11  ;;  %vm243_vm0 = vcmp.eq.s32.totalorder %v849_v15, 0  ;;  %vm244_vm1 = vcmp.eq.s32.totalorder %v849_v15, 127  ;;  %v290_v31 = vsub.s32 0, %v265_v14  ;;  %s651_s12 = scalar_lea.vmem %s650_s11, 64 }
  0x23   : > { %v253_v1 = vld [vmem:[#allocation2] sm:$0x3]  ;;  %325 = vperm.xlu1 %643, %v246_v4   ;;  %v266_v16 = vsub.s32 %v263_v13, %v265_v14 }
  0x24   : > { %254 = vrot.lane.b32.xlu0 %v253_v1, %s724_s13 }
  0x25   : > { %v307_v17 = vrot.slane %v253_v1, %v266_v16 }
  0x27   : > { %386 = vperm.xlu1 %643, %v248_v6   ;;  %v308_v21 = vcombine.high %v307_v17, %v307_v17  ;;  %v315_v27 = vrot.slane %v307_v17, %v266_v16 }
  0x28   : > { %257 = vrot.lane.b32.xlu0 %v253_v1, %s725_s18 }
  0x29   : > { %v322_v28 = vrot.slane %v308_v21, %v266_v16  ;;  %v331_v34 = vrot.slane %v315_v27, %v290_v31 }
  0x2b   : > { %395 = vperm.xlu1 %643, %v249_v8   ;;  %v335_v35 = vrot.slane %v322_v28, %v290_v31 }
  0x2c   : > { %367 = vperm.xlu0 %644, %v247_v5  }
  0x2f   : > { %414 = vperm.xlu1 %643, %v250_v9  }
  0x30   : > { %433 = vperm.xlu0 %644, %v251_v7  }
  0x96   : > { %v255_v18 = vpop.permute.xlu0 %254 }
  0x97   : > { %v256_v19 = vsel %vm243_vm0, 0.0, %v255_v18 }
  0x98   : > { %v267_v20 = vrot.slane %v256_v19, %v266_v16 }
  0x9a   : > { %v268_v22 = vcombine.high %v267_v20, %v267_v20  ;;  %v258_v23 = vpop.permute.xlu0 %257  ;;  %v275_v30 = vrot.slane %v267_v20, %v266_v16  ;;  %v286_v32 = vpop.permute.xlu1 %285 }
  0x9b   : > { %v259_v24 = vsel %vm244_vm1, 0.0, %v258_v23 }
  0x9c   : > { %v349_v25 = vrot.slane %v259_v24, %v266_v16  ;;  %v282_v26 = vrot.slane %v268_v22, %v266_v16  ;;  %v291_v38 = vrot.slane %v275_v30, %v290_v31 }
  0x9e   : > { %v350_v29 = vcombine.high %v349_v25, %v349_v25  ;;  %v295_v33 = vrot.slane %v282_v26, %v290_v31  ;;  %v357_v36 = vrot.slane %v349_v25, %v266_v16  ;;  %v326_v39 = vpop.permute.xlu1 %325  ;;  %v298_v40 = vmul.f32 %v291_v38, %v286_v32 }
  0x9f   : > { %v338_v42 = vmul.f32 %v331_v34, %v326_v39  ;;  %v339_v43 = vmul.f32 %v335_v35, %v326_v39 }
  0xa0   : > { %v364_v37 = vrot.slane %v350_v29, %v266_v16  ;;  %v299_v41 = vmul.f32 %v295_v33, %v286_v32  ;;  %v373_v44 = vrot.slane %v357_v36, %v290_v31 }
  0xa1   : > { %v340_v46 = vadd.f32 %v338_v42, %v298_v40  ;;  %v450_v42 = vstv %s252_s17 }
  0xa2   : > { %v377_v45 = vrot.slane %v364_v37, %v290_v31  ;;  %v341_v47 = vadd.f32 %v339_v43, %v299_v41  ;;  %v387_v51 = vpop.permute.xlu1 %386 }
  0xa6   : > { %v396_v59 = vpop.permute.xlu1 %395 }
  0xa7   : > { %v368_v48 = vpop.permute.xlu0 %367 }
  0xa8   : > { %v380_v49 = vmul.f32 %v373_v44, %v368_v48  ;;  %v381_v50 = vmul.f32 %v377_v45, %v368_v48 }
  0xaa   : > { %v382_v52 = vadd.f32 %v380_v49, %v340_v46  ;;  %v383_v53 = vadd.f32 %v381_v50, %v341_v47  ;;  %v415_v27 = vpop.permute.xlu1 %414 }
  0xab   : > { %v434_v58 = vpop.permute.xlu0 %433 }
  0xac   : > { %v389_v54 = vadd.f32 %v387_v51, %v382_v52  ;;  %v390_v55 = vadd.f32 %v387_v51, %v383_v53 }
  0xae   : > { %v391_v56 = vmax.f32 %v389_v54, 0.0  ;;  %v392_v57 = vmax.f32 %v390_v55, 0.0 }
  0xb0   : > { %v436_v60 = vmul.f32 %v434_v58, %v391_v56  ;;  %v437_v61 = vmul.f32 %v434_v58, %v392_v57  ;;  %v398_v62 = vmul.f32 %v396_v59, %v391_v56  ;;  %v399_v63 = vmul.f32 %v396_v59, %v392_v57 }
  0xb1   : > { %v417_v28 = vmul.f32 %v415_v27, %v391_v56  ;;  %v418_v29 = vmul.f32 %v415_v27, %v392_v57 }
  0xb2   : > { %v438_v0 = vrot.slane %v436_v60, 4  ;;  %v444_v1 = vrot.slane %v437_v61, 4  ;;  %v400_v2 = vrot.slane %v398_v62, 4  ;;  %v406_v3 = vrot.slane %v399_v63, 4 }
  0xb3   : > { %v419_v30 = vrot.slane %v417_v28, 4  ;;  %v425_v31 = vrot.slane %v418_v29, 4 }
  0xb4   : > { %v439_v4 = vadd.f32 %v438_v0, %v436_v60  ;;  %v445_v5 = vadd.f32 %v444_v1, %v437_v61  ;;  %v401_v6 = vadd.f32 %v400_v2, %v398_v62  ;;  %v407_v7 = vadd.f32 %v406_v3, %v399_v63 }
  0xb5   : > { %v420_v32 = vadd.f32 %v419_v30, %v417_v28  ;;  %v426_v33 = vadd.f32 %v425_v31, %v418_v29 }
  0xb6   : > { %v440_v8 = vrot.slane %v439_v4, 2  ;;  %v446_v9 = vrot.slane %v445_v5, 2  ;;  %v402_v10 = vrot.slane %v401_v6, 2  ;;  %v408_v11 = vrot.slane %v407_v7, 2 }
  0xb7   : > { %v421_v34 = vrot.slane %v420_v32, 2  ;;  %v427_v35 = vrot.slane %v426_v33, 2 }
  0xb8   : > { %v441_v12 = vadd.f32 %v440_v8, %v439_v4  ;;  %v447_v13 = vadd.f32 %v446_v9, %v445_v5  ;;  %v403_v14 = vadd.f32 %v402_v10, %v401_v6  ;;  %v409_v16 = vadd.f32 %v408_v11, %v407_v7 }
  0xb9   : > { %v422_v36 = vadd.f32 %v421_v34, %v420_v32  ;;  %v428_v37 = vadd.f32 %v427_v35, %v426_v33 }
  0xba   : > { %v442_v17 = vrot.slane %v441_v12, 1  ;;  %v448_v18 = vrot.slane %v447_v13, 1  ;;  %v404_v19 = vrot.slane %v403_v14, 1  ;;  %v410_v20 = vrot.slane %v409_v16, 1 }
  0xbb   : > { %v429_v38 = vrot.slane %v428_v37, 1  ;;  %v423_v39 = vrot.slane %v422_v36, 1 }
  0xbc   : > { %v443_v21 = vadd.f32 %v442_v17, %v441_v12  ;;  %v449_v22 = vadd.f32 %v448_v18, %v447_v13  ;;  %v405_v23 = vadd.f32 %v404_v19, %v403_v14  ;;  %v411_v24 = vadd.f32 %v410_v20, %v409_v16 }
  0xbd   : > { %v424_v40 = vadd.f32 %v423_v39, %v422_v36  ;;  %v430_v41 = vadd.f32 %v429_v38, %v428_v37 }
  0xbe   : > { %v469_v25 = vsel %vm455_vm2, %v449_v22, %v443_v21  ;;  %v456_v26 = vsel %vm455_vm2, %v411_v24, %v405_v23 }
  0xbf   : > { %471 = vrot.lane.b32.xlu1 %v469_v25, %s725_s18  ;;  %458 = vrot.lane.b32.xlu0 %v456_v26, %s724_s13  ;;  %v451_v47 = vadd.f32 %v450_v42, %v424_v40  ;;  %v452_v48 = vadd.f32 %v450_v42, %v430_v41  ;;  %s581_s13 = sshll.u32 %s713_s23, 5  ;;  %s502_s18 = sshll.u32 %s230_s10, 4  ;;  %s873_s18 = int_to_ptr.vmem [resolvable:$true] %s502_s18 }
  0xc0   : > { %s871_s26 = scalar_lea.hbm %s927_s5, %s581_s13  ;;  %s488_s23 = scalar_lea.sflag [#allocation5], %s228_s8 }
  0xc1   : > { %s645_s28 = scalar_lea.vmem %s873_s18, 32  ;;  %p652_p1 = scmp.lt.s32.totalorder %s873_s18, %s650_s11 }
  0xc2   : > { %p646_p12 = scmp.ne.s32.totalorder %s873_s18, %s645_s28  ;;  %p653_p2 = scmp.lt.s32.totalorder %s651_s12, %s645_s28 }
  0xc4   : > { %p647_p13 = pnand %p646_p12, %p801_p4  ;;  %p654_p3 = por %p653_p2, %p652_p1 }
  0xc6   : > { %p648_p0 = pneg %p647_p13 }
  0xc8   : > { %p655_p5 = pnand %p654_p3, %p648_p0 }
 0x131   : > { %v472_v43 = vpop.permute.xlu1 %471  ;;  %v459_v44 = vpop.permute.xlu0 %458 }
 0x132   : > { %v473_v45 = vsel %vm244_vm1, 0.0, %v472_v43  ;;  %v460_v46 = vsel %vm243_vm0, 0.0, %v459_v44 }
 0x133   : > { %v462_v49 = vrot.slane %v460_v46, 1  ;;  %v475_v50 = vrot.slane %v473_v45, 1  ;;  %v465_v51 = vadd.f32 %v460_v46, %v451_v47 }
 0x135   : > { %v466_v52 = vadd.f32 %v462_v49, %v452_v48  ;;  %v478_v54 = vadd.f32 %v473_v45, %v465_v51 }
 0x137   : > { %v479_v53 = vadd.f32 %v475_v50, %v466_v52 }
 0x139   : > { %v482_v55 = vrot.slane %v479_v53, 7 }
 0x13b   : > { %v483_v15 = vsel %vm455_vm2, %v482_v55, %v478_v54 }
 0x13c   : > { %485 = vst [vmem:[%s230_s10] sm:$0x3] %v483_v15  ;;  %486 = vst [vmem:[#allocation2] sm:$0x3] %v483_v15 }
 0x13d   : > { %658 = shalt.err (!%p655_p5)
}
 0x13e   : > { %s659_s9 = scalar_lea.hbm %s871_s26, 32  ;;  %s663_s14 = scalar_lea.hbm %s927_s5, 128 }
 0x13f   : > { %p660_p6 = scmp.ne.s32.totalorder %s871_s26, %s659_s9  ;;  %p664_p10 = scmp.lt.s32.totalorder %s871_s26, %s927_s5 }
 0x140   : > { %p665_p11 = scmp.lt.s32.totalorder %s663_s14, %s659_s9 }
 0x141   : > { %p661_p7 = pnand %p660_p6, %p801_p4 }
 0x142   : > { %p666_p12 = por %p665_p11, %p664_p10 }
 0x143   : > { %p662_p9 = pneg %p661_p7 }
 0x145   : > { %p667_p13 = pnand %p666_p12, %p662_p9 }
 0x147   : > { %670 = shalt.err (!%p667_p13)
}
 0x148   : > { %584 = dma.vmem_to_hbm [thread:$0]  (%p801_p4), %s873_s18, 32, %s871_s26, %s488_s23  }
 0x149 PF: > { %p590_p0 = scmp.ge.s32.totalorder %s721_s25, 2  ;;  %s514_s17 = sand.u32 1, %s701_s20  }
 0x14a   : > { %s515_s13 = scalar_lea.sflag [#allocation5], %s514_s17 }
 0x14b   : > { %p587_p1 = pnand %p590_p0, %p808_p8 }
 0x14d   : > { %p588_p2 = pneg %p587_p1 }
 0x14f   : > { %696 = dma.done.wait (%p588_p2), %s515_s13, 32  }
 0x150   : > { %698 = vsyncadd (%p588_p2), %s515_s13, 4294967264  ;;  %s19_s25 = sadd.s32 1, %s721_s25   ;;  %s930_s20 = smov %s705_s21 }
 0x151   : > { %p16_p3 = scmp.ge.s32.totalorder %s19_s25, 6   ;;  %s931_s21 = smov %s709_s22 }
 0x152   : > { %s932_s22 = smov %s814_s7  ;;  %s933_s23 = smov %s717_s24 }
 0x153   : > { %s934_s24 = smov %s936_s27  ;;  %18 = sbr.rel (!%p16_p3) target bundleno = 6 (0x6), region = 79 }
 0x158   :  { %520 = vsyncpa [#allocation5], 1 }
 0x159   :  { %522 = vsyncpa [#allocation5 + $0x1], 1 }

</bundles_post_ra>
